<compile_context>
chip_gen: v6e
topology: v6e:2x2x1
jax: 0.10.0
libtpu: 0.0.40
codegen_flags: <defaults>
</compile_context>

<pallas_src>
import jax
import jax.numpy as jnp
from jax import lax
from jax.experimental import pallas as pl
from jax.experimental.pallas import tpu as pltpu

# --- SimulationParams equivalent (small, deterministic) ---
NSIM = 8            # batch of simulated systems
NQ = 4              # generalized positions
NV = 4              # generalized velocities
NX = NQ + NV        # state dim
HID = 32            # value-net hidden width
STEP = 1.0

# fused-rollout (explicit Euler) demo constants
NSTEPS = 16
DT = 0.01

LANE = 128                      # vreg lane width; batch lives on lanes
P_ROWS = 2 * NX + 2 * HID       # packed params slab rows: [W1 | b1 | w2 | qdiag]

assert NQ == NV and NX == 2 * NQ    # cat(v, u) spans nx; half-rotation trick
assert NX % 8 == 0 and HID % 8 == 0  # tile-aligned sublane offsets in the slab

# Rough per-projection-step cost (for one 128-lane tile).
_STEP_FLOPS = 2 * (2 * NX * HID * LANE) + 32 * NX * LANE
_STEP_TRANS = HID * LANE


def _unpack_params(p_ref):
    """Slice the packed (P_ROWS, LANE) parameter slab (all offsets 8-aligned)."""
    w1 = p_ref[pl.ds(0, NX), pl.ds(0, HID)]            # (NX, HID)
    b1b = p_ref[pl.ds(NX, HID), :]                      # (HID, LANE) pre-broadcast
    w2b = p_ref[pl.ds(NX + HID, HID), :]                # (HID, LANE) pre-broadcast
    qdb = p_ref[pl.ds(NX + 2 * HID, NX), :]             # (NX, LANE)  pre-broadcast
    return w1, b1b, w2b, qdb


def _derivative(x, w1, b1b, w2b, qdb, is_vel):
    """xd = cat(v, u) of the projected system, transposed layout (NX, LANE)."""
    # value net and analytic dV/dx (replaces torch.autograd.grad)
    h = jnp.tanh(
        lax.dot_general(w1, x, (((0,), (0,)), ((), ())),
                        preferred_element_type=jnp.float32) + b1b)           # (HID, LANE)
    g = w2b * (1.0 - h * h)                                                  # (HID, LANE)
    vx = jnp.dot(w1, g, preferred_element_type=jnp.float32)                  # (NX, LANE)

    # velocity rows moved to sublanes 0..NV-1 (half sublane rotation, NQ==NV==NX/2)
    v_top = pltpu.roll(x, shift=NQ, axis=0)                                  # (NX, LANE)

    # loss(x) = x Q x^T with diagonal Q
    loss = jnp.sum(qdb * x * x, axis=0, keepdims=True)                       # (1, LANE)
    # Vx @ xd^T with xd = cat(v, 0): only the first NV components of Vx contribute
    vx_dot_xd = jnp.sum(jnp.where(is_vel, vx * v_top, 0.0), axis=0, keepdims=True)
    # norm = sqrt(Vx @ Vx^T + 1e-6)
    norm = jnp.sqrt(jnp.sum(vx * vx, axis=0, keepdims=True) + 1e-6)
    # unnorm_proj = relu(Vx @ xd^T + step * loss(x))
    unnorm = jnp.maximum(vx_dot_xd + STEP * loss, 0.0)
    # xd_trans = -(Vx / norm) * unnorm_proj, clipped; u = rows NV..
    u_full = jnp.clip(-(vx / norm) * unnorm, -40.0, 40.0)
    # out = cat(v, u): rows < NV come from v, rows >= NV from the clipped proj.
    return jnp.where(is_vel, v_top, u_full)


def _pds_forward_kernel(x_ref, p_ref, out_ref):
    w1, b1b, w2b, qdb = _unpack_params(p_ref)
    is_vel = lax.broadcasted_iota(jnp.int32, (NX, LANE), 0) < NV
    out_ref[...] = _derivative(x_ref[...], w1, b1b, w2b, qdb, is_vel)


def _pds_rollout_kernel(x_ref, p_ref, out_ref):
    # Params loaded once; state carried as a register value across all steps.
    w1, b1b, w2b, qdb = _unpack_params(p_ref)
    is_vel = lax.broadcasted_iota(jnp.int32, (NX, LANE), 0) < NV

    def euler_step(_, x):
        return x + DT * _derivative(x, w1, b1b, w2b, qdb, is_vel)

    out_ref[...] = lax.fori_loop(0, NSTEPS, euler_step, x_ref[...], unroll=True)


def _pds_call(kernel, x_t, packed_params, n_tiles, flops, trans):
    b_pad = n_tiles * LANE
    return pl.pallas_call(
        kernel,
        out_shape=jax.ShapeDtypeStruct((NX, b_pad), jnp.float32),
        grid=(n_tiles,),
        in_specs=[
            pl.BlockSpec((NX, LANE), lambda i: (0, i)),       # state, batch on lanes
            pl.BlockSpec((P_ROWS, LANE), lambda i: (0, 0)),   # packed params slab
        ],
        out_specs=pl.BlockSpec((NX, LANE), lambda i: (0, i)),
        compiler_params=pltpu.CompilerParams(dimension_semantics=("parallel",)),
        cost_estimate=pl.CostEstimate(
            flops=flops, transcendentals=trans,
            bytes_accessed=4 * (2 * NX * b_pad + P_ROWS * LANE)),
    )(x_t, packed_params)


def pack_params(params):
    """Pack (w1, b1, w2, qdiag) into one lane-dense slab.  Call ONCE, reuse."""
    w1, b1, w2, qdiag = params
    w1p = jnp.zeros((NX, LANE), jnp.float32).at[:, :HID].set(w1.astype(jnp.float32))
    b1b = jnp.broadcast_to(b1.reshape(HID, 1).astype(jnp.float32), (HID, LANE))
    w2b = jnp.broadcast_to(w2.reshape(HID, 1).astype(jnp.float32), (HID, LANE))
    qdb = jnp.broadcast_to(qdiag.reshape(NX, 1).astype(jnp.float32), (NX, LANE))
    return jnp.concatenate([w1p, b1b, w2b, qdb], axis=0)      # (P_ROWS, LANE)


def _pack_state(x3d):
    """(nsim, 1, NX) -> zero-padded (NX, n_tiles*128) batch-on-lanes layout."""
    nsim = x3d.shape[0]
    n_tiles = pl.cdiv(nsim, LANE)
    xt = jnp.zeros((NX, n_tiles * LANE), jnp.float32)
    xt = xt.at[:, :nsim].set(x3d.reshape(nsim, NX).T.astype(jnp.float32))
    return xt, n_tiles, nsim


@jax.jit
def projected_dynamical_system_forward(t, x, packed_params):
    """x: (nsim, 1, NX) f32, t: scalar (unused by dV/dx). Returns (nsim, 1, NX)."""
    del t  # value-net gradient w.r.t. x does not depend on t for this net
    xt, n_tiles, nsim = _pack_state(x)
    out_t = _pds_call(_pds_forward_kernel, xt, packed_params, n_tiles,
                      _STEP_FLOPS * n_tiles, _STEP_TRANS * n_tiles)
    return out_t[:, :nsim].T.reshape(nsim, 1, NX)


@jax.jit
def projected_dynamical_system_rollout(x0, packed_params):
    """Fused NSTEPS-step explicit-Euler integration; state stays in registers."""
    xt, n_tiles, nsim = _pack_state(x0)
    out_t = _pds_call(_pds_rollout_kernel, xt, packed_params, n_tiles,
                      NSTEPS * _STEP_FLOPS * n_tiles, NSTEPS * _STEP_TRANS * n_tiles)
    return out_t[:, :nsim].T.reshape(nsim, 1, NX)


# ----------------------------------------------------------------------------
# Pure-JAX references matching the PyTorch forward semantics.
# ----------------------------------------------------------------------------
def reference_forward(t, x, params):
    del t
    w1, b1, w2, qdiag = params
    nsim = x.shape[0]
    xb = x.reshape(nsim, NX)
    h = jnp.tanh(xb @ w1 + b1)
    vx = (w2 * (1.0 - h * h)) @ w1.T
    v = xb[:, NQ:]
    xd = jnp.concatenate([v, jnp.zeros_like(v)], axis=-1)
    loss = jnp.sum(qdiag * xb * xb, axis=-1, keepdims=True)
    norm = jnp.sqrt(jnp.sum(vx * vx, axis=-1, keepdims=True) + 1e-6)
    unnorm = jax.nn.relu(jnp.sum(vx * xd, axis=-1, keepdims=True) + STEP * loss)
    xd_trans = -(vx / norm) * unnorm
    u = jnp.clip(xd_trans[:, NV:], -40.0, 40.0)
    return jnp.concatenate([v, u], axis=-1).reshape(nsim, 1, NX)


def reference_rollout(x0, params):
    def body(_, x):
        xd = reference_forward(None, x, params)
        return x + DT * xd
    return lax.fori_loop(0, NSTEPS, body, x0)


if __name__ == "__main__":
    key = jax.random.PRNGKey(0)
    k_w1, k_b1, k_w2, k_q, k_x = jax.random.split(key, 5)

    # deterministic synthetic parameters (shapes implied by the module wiring)
    w1 = jax.random.normal(k_w1, (NX, HID), jnp.float32) * 0.5
    b1 = jax.random.normal(k_b1, (1, HID), jnp.float32) * 0.1
    w2 = jax.random.normal(k_w2, (1, HID), jnp.float32) * 0.5
    qdiag = jnp.abs(jax.random.normal(k_q, (1, NX), jnp.float32)) + 0.5
    params = (w1, b1, w2, qdiag)
    packed = jax.block_until_ready(pack_params(params))   # packed once, reused

    # input: x of shape (nsim, 1, nq + nv), scalar time t
    x = jax.random.normal(k_x, (NSIM, 1, NX), jnp.float32)
    t = jnp.float32(0.0)

    # single forward step (the module's forward())
    out = jax.block_until_ready(projected_dynamical_system_forward(t, x, packed))
    ref = reference_forward(t, x, params)
    assert out.shape == (NSIM, 1, NX)
    assert jnp.allclose(out, ref, atol=1e-4, rtol=1e-4)

    # fused multi-step Euler rollout (loop hoisted into the kernel, register carry)
    xf = jax.block_until_ready(projected_dynamical_system_rollout(x, packed))
    rf = reference_rollout(x, params)
    assert xf.shape == (NSIM, 1, NX)
    assert jnp.allclose(xf, rf, atol=1e-3, rtol=1e-3)

    print("KERNEL_OK")
</pallas_src>

<mosaic_0001>
module attributes {stable_mosaic.version = 11 : i64} {
  func.func @_pds_forward_kernel(%arg0: i32, %arg1: memref<8x128xf32, #tpu.memory_space<vmem>>, %arg2: memref<80x128xf32, #tpu.memory_space<vmem>>, %arg3: memref<8x128xf32, #tpu.memory_space<vmem>>) attributes {dimension_semantics = [#tpu.dimension_semantics<parallel>], iteration_bounds = array<i64: 1>, scalar_prefetch = 0 : i64, scratch_operands = 0 : i64, tpu.core_type = #tpu.core_type<tc>, window_params = [{transform_indices = @transform_0, window_bounds = array<i64: 8, 128>}, {pipeline_mode = #tpu.pipeline_mode<synchronous>, transform_indices = @transform_1, window_bounds = array<i64: 80, 128>}, {transform_indices = @transform_2, window_bounds = array<i64: 8, 128>}]} {
    %c0 = arith.constant 0 : index
    %c0_0 = arith.constant 0 : index
    %0 = vector.load %arg2[%c0, %c0_0] : memref<80x128xf32, #tpu.memory_space<vmem>>, vector<8x32xf32>
    %c8 = arith.constant 8 : index
    %c0_1 = arith.constant 0 : index
    %1 = vector.load %arg2[%c8, %c0_1] : memref<80x128xf32, #tpu.memory_space<vmem>>, vector<32x128xf32>
    %c40 = arith.constant 40 : index
    %c0_2 = arith.constant 0 : index
    %2 = vector.load %arg2[%c40, %c0_2] : memref<80x128xf32, #tpu.memory_space<vmem>>, vector<32x128xf32>
    %c72 = arith.constant 72 : index
    %c0_3 = arith.constant 0 : index
    %3 = vector.load %arg2[%c72, %c0_3] : memref<80x128xf32, #tpu.memory_space<vmem>>, vector<8x128xf32>
    %4 = tpu.iota {dimensions = array<i32: 0>} : vector<8x128xi32>
    %c4_i32 = arith.constant 4 : i32
    %5 = vector.broadcast %c4_i32 : i32 to vector<8x128xi32>
    %6 = arith.cmpi slt, %4, %5 : vector<8x128xi32>
    %c0_4 = arith.constant 0 : index
    %c0_5 = arith.constant 0 : index
    %7 = vector.load %arg1[%c0_4, %c0_5] : memref<8x128xf32, #tpu.memory_space<vmem>>, vector<8x128xf32>
    %cst = arith.constant dense<0.000000e+00> : vector<32x128xf32>
    %8 = tpu.matmul %0, %7, %cst {dimension_numbers = #tpu.dot_dimension_numbers<[0], [0], [1], [1], [0, 1, 1, 1], [], []>} : vector<8x32xf32>, vector<8x128xf32>, vector<32x128xf32> -> vector<32x128xf32>
    %9 = arith.addf %8, %1 : vector<32x128xf32>
    %10 = math.tanh %9 : vector<32x128xf32>
    %11 = arith.mulf %10, %10 : vector<32x128xf32>
    %cst_6 = arith.constant 1.000000e+00 : f32
    %12 = vector.broadcast %cst_6 : f32 to vector<32x128xf32>
    %13 = arith.subf %12, %11 : vector<32x128xf32>
    %14 = arith.mulf %2, %13 : vector<32x128xf32>
    %cst_7 = arith.constant dense<0.000000e+00> : vector<8x128xf32>
    %15 = tpu.matmul %0, %14, %cst_7 {dimension_numbers = #tpu.dot_dimension_numbers<[1], [0], [0], [1], [0, 0, 1, 1], [], []>} : vector<8x32xf32>, vector<32x128xf32>, vector<8x128xf32> -> vector<8x128xf32>
    %c4_i32_8 = arith.constant 4 : i32
    %16 = tpu.dynamic_rotate %7 by %c4_i32_8 dim 0 : vector<8x128xf32>, i32 -> vector<8x128xf32>
    %17 = arith.mulf %3, %7 : vector<8x128xf32>
    %18 = arith.mulf %17, %7 : vector<8x128xf32>
    %cst_9 = arith.constant dense<0.000000e+00> : vector<128xf32>
    %19 = vector.multi_reduction <add>, %18, %cst_9 [0] : vector<8x128xf32> to vector<128xf32>
    %20 = vector.shape_cast %19 : vector<128xf32> to vector<1x128xf32>
    %21 = arith.mulf %15, %16 : vector<8x128xf32>
    %cst_10 = arith.constant 0.000000e+00 : f32
    %22 = vector.broadcast %cst_10 : f32 to vector<8x128xf32>
    %23 = arith.select %6, %21, %22 : vector<8x128xi1>, vector<8x128xf32>
    %cst_11 = arith.constant dense<0.000000e+00> : vector<128xf32>
    %24 = vector.multi_reduction <add>, %23, %cst_11 [0] : vector<8x128xf32> to vector<128xf32>
    %25 = vector.shape_cast %24 : vector<128xf32> to vector<1x128xf32>
    %26 = arith.mulf %15, %15 : vector<8x128xf32>
    %cst_12 = arith.constant dense<0.000000e+00> : vector<128xf32>
    %27 = vector.multi_reduction <add>, %26, %cst_12 [0] : vector<8x128xf32> to vector<128xf32>
    %28 = vector.shape_cast %27 : vector<128xf32> to vector<1x128xf32>
    %cst_13 = arith.constant 9.99999997E-7 : f32
    %29 = vector.broadcast %cst_13 : f32 to vector<1x128xf32>
    %30 = arith.addf %28, %29 : vector<1x128xf32>
    %31 = math.sqrt %30 : vector<1x128xf32>
    %cst_14 = arith.constant 1.000000e+00 : f32
    %32 = vector.broadcast %cst_14 : f32 to vector<1x128xf32>
    %33 = arith.mulf %32, %20 : vector<1x128xf32>
    %34 = arith.addf %25, %33 : vector<1x128xf32>
    %cst_15 = arith.constant 0.000000e+00 : f32
    %35 = vector.broadcast %cst_15 : f32 to vector<1x128xf32>
    %36 = arith.maximumf %34, %35 : vector<1x128xf32>
    %37 = vector.broadcast %31 : vector<1x128xf32> to vector<8x128xf32>
    %38 = arith.divf %15, %37 : vector<8x128xf32>
    %cst_16 = arith.constant 0.000000e+00 : f32
    %39 = vector.broadcast %cst_16 : f32 to vector<8x128xf32>
    %40 = arith.subf %39, %38 : vector<8x128xf32>
    %41 = vector.broadcast %36 : vector<1x128xf32> to vector<8x128xf32>
    %42 = arith.mulf %40, %41 : vector<8x128xf32>
    %cst_17 = arith.constant -4.000000e+01 : f32
    %cst_18 = arith.constant 4.000000e+01 : f32
    %43 = vector.broadcast %cst_17 : f32 to vector<8x128xf32>
    %44 = arith.maximumf %43, %42 : vector<8x128xf32>
    %45 = vector.broadcast %cst_18 : f32 to vector<8x128xf32>
    %46 = arith.minimumf %45, %44 : vector<8x128xf32>
    %47 = arith.select %6, %16, %46 : vector<8x128xi1>, vector<8x128xf32>
    %c0_19 = arith.constant 0 : index
    %c0_20 = arith.constant 0 : index
    %48 = vector.load %arg3[%c0_19, %c0_20] : memref<8x128xf32, #tpu.memory_space<vmem>>, vector<8x128xf32>
    tpu.vector_store %arg3[%c0_19, %c0_20], %47 {strides = array<i32>} : memref<8x128xf32, #tpu.memory_space<vmem>>, vector<8x128xf32>,
    return
  }
  func.func @transform_0(%arg0: i32) -> (i32, i32) {
    %c0_i32 = arith.constant 0 : i32
    %c0_i32_0 = arith.constant 0 : i32
    return %c0_i32, %arg0 : i32, i32
  }
  func.func @transform_1(%arg0: i32) -> (i32, i32) {
    %c0_i32 = arith.constant 0 : i32
    %c0_i32_0 = arith.constant 0 : i32
    %c0_i32_1 = arith.constant 0 : i32
    return %c0_i32, %c0_i32_0 : i32, i32
  }
  func.func @transform_2(%arg0: i32) -> (i32, i32) {
    %c0_i32 = arith.constant 0 : i32
    %c0_i32_0 = arith.constant 0 : i32
    return %c0_i32, %arg0 : i32, i32
  }
}

</mosaic_0001>

<bundles_post_ra>
// kernel: projected_dynamical_system_forward.1
= control target key start
LH: loop header
LB: loop body
LE: loop exit
PB: predicated region body
PF: predicated region fallthrough
CT: control target
= control target key end

     0   :  { %7 = vsyncpa [#allocation3], 0  ;;  %s380_s9 = smov [#allocation2]   ;;  %s418_s0 = inlined_call_operand.vmem [shape: f32[8,128], index: 0, kind: input, shape index: {}]   ;;  %s419_s1 = inlined_call_operand.hbm [shape: f32[80,128], index: 1, kind: input, shape index: {}]   ;;  %s420_s2 = inlined_call_operand.vmem [shape: f32[8,128], index: 2, kind: output, shape index: {}]  }
   0x1   :  { %s15_s10 = sshll.u32 %s380_s9, 4  ;;  %s16_s10 = int_to_ptr.vmem [resolvable:$true] %s15_s10 }
   0x2   :  { %s366_s11 = scalar_lea.vmem %s16_s10, 1280  ;;  %p371_p1 = scmp.lt.s32.totalorder %s16_s10, %s16_s10 }
   0x3   :  { %p367_p0 = scmp.ne.s32.totalorder %s16_s10, %s366_s11  ;;  %p372_p2 = scmp.lt.s32.totalorder %s366_s11, %s366_s11 }
   0x5   :  { %p373_p3 = por %p372_p2, %p371_p1 }
   0x7   :  { %p374_p4 = pnand %p373_p3, %p367_p0 }
   0x9   :  { %377 = shalt.err (!%p374_p4)
}
   0xa   :  { %s381_s12 = smov 128   ;;  %s382_s13 = smov 8  }
   0xb   :  { %21 = dma.hbm_to_vmem [thread:$0]  %s419_s1, 1280, %s16_s10, [#allocation3], %s381_s12, %s381_s12, %s382_s13  }
   0xc   :  { %378 = dma.done.wait [#allocation3], 1280  }
   0xd   :  { %379 = vsyncadd [#allocation3], 4294966016  ;;  %v25_v0 = vld [vmem:[#allocation2] sm:$0xff]  ;;  %vm71_vm0 = vcmask 64512   ;;  %v383_v6 = vmov 0.0   ;;  %vm384_vm1 = vmmov 0   ;;  %v35_v45 = vlaneseq }
   0xe   :  { %v406_v1 = vld [vmem:[%s418_s0] sm:$0xff]  ;;  %39 = vxpose.xlu0.b32.start.end [1/1] (short) (narrow) %v25_v0, 32  ;;  %330 = vmatprep.subr.mxu1 %v383_v6  ;;  %v27_v8 = vld [vmem:[#allocation2 + $0x10] sm:$0xff]  ;;  %v26_v10 = vld [vmem:[#allocation2 + $0x8] sm:$0xff]  ;;  %vm185_vm2 = vcmask 261120  }
   0xf   :  { %322 = vmatprep.subr.mxu0 %v406_v1  ;;  %338 = vmatprep.mubr.msk.f32.mxu1 %vm384_vm1, %v383_v6  ;;  %v29_v13 = vld [vmem:[#allocation2 + $0x20] sm:$0xff]  ;;  %v28_v15 = vld [vmem:[#allocation2 + $0x18] sm:$0xff]  ;;  %v31_v33 = vld [vmem:[#allocation2 + $0x30] sm:$0xff]  ;;  %v259_v49 = vrot.slane %v406_v1, 4  ;;  %v36_v50 = vshrl.u32 %v35_v45, 7 }
  0x10   :  { %323 = vmatpush3.msra.mxu0 %v406_v1  ;;  %v33_v25 = vld [vmem:[#allocation2 + $0x40] sm:$0xff]  ;;  %v32_v29 = vld [vmem:[#allocation2 + $0x38] sm:$0xff]  ;;  %v30_v36 = vld [vmem:[#allocation2 + $0x28] sm:$0xff] }
  0x11   :  { %v34_v48 = vld [vmem:[#allocation2 + $0x48] sm:$0xff]  ;;  %vm37_vm3 = vcmp.lt.s32.totalorder %v36_v50, 4 }
  0x12   :  { %v260_v52 = vmul.f32 %v406_v1, %v34_v48 }
  0x14   :  { %v261_v55 = vmul.f32 %v260_v52, %v406_v1 }
  0x16   :  { %v262_v57 = vrot.slane %v261_v55, 4 }
  0x18   :  { %v263_v59 = vadd.f32 %v262_v57, %v261_v55 }
  0x1a   :  { %v264_v62 = vrot.slane %v263_v59, 2 }
  0x8a   :  { %v55_v2 = vpop.trf.xlu0 }
  0x8b   :  { %324 = vmatprep.mubr.msk.f32.mxu0 %vm71_vm0, %v55_v2 }
  0x8e   :  { %v56_v3 = vpop.trf.xlu0 }
  0x8f   :  { %325 = vmatmul.mubr.msk.f32.vlgmr.msra.gmra.mxu0 %vm71_vm0, %v56_v3 }
  0x92   :  { %v57_v4 = vpop.trf.xlu0 }
  0x93   :  { %327 = vmatprep.mubr.msk.f32.mxu0 %vm71_vm0, %v57_v4 }
  0x96   :  { %v58_v5 = vpop.trf.xlu0 }
  0x97   :  { %328 = vmatmul.mubr.msk.f32.gmra.mxu0 %vm71_vm0, %v58_v5  ;;  %v265_v5 = vadd.f32 %v264_v62, %v263_v59 }
 0x14f   :  { %v326_v7 = vpop.f32.mrf.mxu0 }
 0x150   :  { %v156_v11 = vadd.f32 %v326_v7, %v27_v8  ;;  %v266_v7 = vrot.slane %v265_v5, 1 }
 0x151   :  { %v150_v9 = vpop.f32.mrf.mxu0 }
 0x152   :  { %v151_v12 = vadd.f32 %v150_v9, %v26_v10  ;;  %346 = vtanh.f32 %v156_v11  ;;  %v267_v8 = vadd.f32 %v266_v7, %v265_v5 }
 0x154   :  { %348 = vtanh.f32 %v151_v12 }
 0x157   :  { %v329_v14 = vpop.f32.mrf.mxu0 }
 0x158   :  { %v166_v16 = vadd.f32 %v329_v14, %v29_v13 }
 0x159   :  { %v160_v17 = vpop.f32.mrf.mxu0 }
 0x15a   :  { %350 = vtanh.f32 %v166_v16  ;;  %v161_v18 = vadd.f32 %v160_v17, %v28_v15 }
 0x15c   :  { %352 = vtanh.f32 %v161_v18 }
 0x15f   :  { %v347_v19 = vpop.eup %346 }
 0x160   :  { %v174_v22 = vmul.f32 %v347_v19, %v347_v19 }
 0x161   :  { %v349_v20 = vpop.eup %348 }
 0x162   :  { %v173_v26 = vmul.f32 %v349_v20, %v349_v20  ;;  %v178_v30 = vsub.f32 1.0, %v174_v22 }
 0x164   :  { %v177_v34 = vsub.f32 1.0, %v173_v26  ;;  %v182_v37 = vmul.f32 %v178_v30, %v31_v33 }
 0x166   :  { %v181_v38 = vmul.f32 %v177_v34, %v30_v36 }
 0x167   :  { %v351_v21 = vpop.eup %350 }
 0x168   :  { %v176_v23 = vmul.f32 %v351_v21, %v351_v21 }
 0x169   :  { %v353_v24 = vpop.eup %352 }
 0x16a   :  { %v175_v27 = vmul.f32 %v353_v24, %v353_v24  ;;  %v180_v28 = vsub.f32 1.0, %v176_v23 }
 0x16c   :  { %v179_v31 = vsub.f32 1.0, %v175_v27  ;;  %v184_v32 = vmul.f32 %v180_v28, %v33_v25 }
 0x16e   :  { %331 = vmatpush3.msra.mxu1 %v184_v32  ;;  %v183_v35 = vmul.f32 %v179_v31, %v32_v29 }
 0x16f   :  { %332 = vmatprep.subr.mxu1 %v383_v6 }
 0x170   :  { %333 = vmatpush3.msra.mxu1 %v183_v35 }
 0x171   :  { %334 = vmatprep.subr.mxu1 %v383_v6 }
 0x172   :  { %335 = vmatpush3.msra.mxu1 %v182_v37 }
 0x173   :  { %336 = vmatprep.subr.mxu1 %v383_v6 }
 0x174   :  { %337 = vmatpush3.msra.mxu1 %v181_v38 }
 0x175   :  { %339 = vmatmul.mubr.msk.f32.vlgmr.msra.gmra.mxu1 %vm185_vm2, %v25_v0 }
 0x235   :  { %v255_v39 = vpop.f32.mrf.mxu1 }
 0x236   :  { %v276_v40 = vmul.f32 %v255_v39, %v255_v39  ;;  %v268_v54 = vmul.f32 %v259_v49, %v255_v39 }
 0x237   :  { %v340_v41 = vpop.f32.mrf.mxu1 }
 0x238   :  { %v277_v42 = vrot.slane %v276_v40, 4  ;;  %v269_v56 = vsel %vm37_vm3, %v268_v54, 0.0 }
 0x239   :  { %v270_v58 = vrot.slane %v269_v56, 4 }
 0x23a   :  { %v278_v43 = vadd.f32 %v277_v42, %v276_v40 }
 0x23b   :  { %v271_v60 = vadd.f32 %v270_v58, %v269_v56 }
 0x23c   :  { %v279_v44 = vrot.slane %v278_v43, 2 }
 0x23d   :  { %v272_v63 = vrot.slane %v271_v60, 2 }
 0x23e   :  { %v280_v46 = vadd.f32 %v279_v44, %v278_v43 }
 0x23f   :  { %v273_v6 = vadd.f32 %v272_v63, %v271_v60 }
 0x240   :  { %v281_v47 = vrot.slane %v280_v46, 1 }
 0x241   :  { %v274_v1 = vrot.slane %v273_v6, 1 }
 0x242   :  { %v282_v51 = vadd.f32 %v281_v47, %v280_v46 }
 0x243   :  { %v275_v9 = vadd.f32 %v274_v1, %v273_v6 }
 0x244   :  { %v283_v53 = vadd.f32 1e-06, %v282_v51 }
 0x245   :  { %v291_v10 = vadd.f32 %v275_v9, %v267_v8 }
 0x246   :  { %354 = vrsqrt.f32 %v283_v53  ;;  %vm286_vm4 = vcmp.eq.f32.partialorder %v283_v53, inf  ;;  %v289_v2 = vand.u32 2147483648, %v283_v53  ;;  %vm288_vm5 = vcmp.eq.f32.partialorder %v283_v53, 0.0 }
 0x247   :  { %v292_v13 = vmax.f32 %v291_v10, 0.0 }
 0x253   :  { %v355_v61 = vpop.eup %354 }
 0x254   :  { %v285_v0 = vmul.f32 %v355_v61, %v283_v53 }
 0x256   :  { %v287_v3 = vsel %vm286_vm4, %v283_v53, %v285_v0 }
 0x257   :  { %v290_v4 = vsel %vm288_vm5, %v289_v2, %v287_v3 }
 0x258   :  { %356 = vrcp.f32 %v290_v4 }
 0x265   :  { %v357_v11 = vpop.eup %356 }
 0x266   :  { %v294_v12 = vmul.f32 %v357_v11, %v255_v39 }
 0x268   :  { %v295_v14 = vsub.f32 0.0, %v294_v12 }
 0x26a   :  { %v296_v15 = vmul.f32 %v295_v14, %v292_v13 }
 0x26c   :  { %v311_v16 = vclamps-f32 %v296_v15, 40.0 }
 0x26e   :  { %v299_v17 = vsel %vm37_vm3, %v259_v49, %v311_v16 }
 0x26f   :  { %300 = vst [vmem:[%s420_s2] sm:$0xff] %v299_v17 }
 0x270   :  { %305 = vsyncpa [#allocation3], 1 }

</bundles_post_ra>
